<compile_context>
chip_gen: v6e
topology: v6e:2x2x1
jax: 0.10.0
libtpu: 0.0.40
codegen_flags: <defaults>
</compile_context>

<pallas_src>
import functools
import math

import jax
import jax.numpy as jnp
from jax.experimental import pallas as pl
from jax.experimental.pallas import tpu as pltpu

_HIDDEN = 128


def _round_up(x, m):
    return ((x + m - 1) // m) * m


def _cdiv(a, b):
    return -(-a // b)


def _gradhnn_kernel(u_ref,
                    w1_ref, b1_ref,
                    w2_ref, b2_ref,
                    w3_ref, b3_ref,
                    w4_ref, b4_ref,
                    out_ref):
    # Layer 1: (tile, D) @ (D, 128); small K is padded internally by the MXU.
    h = jnp.dot(u_ref[...].astype(jnp.bfloat16), w1_ref[...],
                preferred_element_type=jnp.float32)
    h = jnp.maximum(h + b1_ref[...], 0.0)
    # Layer 2
    h = jnp.dot(h.astype(jnp.bfloat16), w2_ref[...], preferred_element_type=jnp.float32)
    h = jnp.maximum(h + b2_ref[...], 0.0)
    # Layer 3
    h = jnp.dot(h.astype(jnp.bfloat16), w3_ref[...], preferred_element_type=jnp.float32)
    h = jnp.maximum(h + b3_ref[...], 0.0)
    # Layer 4 (no activation): (tile, 128) @ (128, D)
    out = jnp.dot(h.astype(jnp.bfloat16), w4_ref[...], preferred_element_type=jnp.float32)
    out_ref[...] = (out + b4_ref[...]).astype(out_ref.dtype)


def init_params(key, manifold_dim, hidden=_HIDDEN):
    """PyTorch nn.Linear-style init. Weights stored pre-transposed as (in, out); biases (1, out)."""
    dims = [(manifold_dim, hidden), (hidden, hidden), (hidden, hidden), (hidden, manifold_dim)]
    params = {}
    for idx, (fan_in, fan_out) in enumerate(dims, start=1):
        key, kw, kb = jax.random.split(key, 3)
        bound = 1.0 / math.sqrt(fan_in)
        params[f"w{idx}"] = jax.random.uniform(
            kw, (fan_in, fan_out), jnp.float32, minval=-bound, maxval=bound)
        params[f"b{idx}"] = jax.random.uniform(
            kb, (1, fan_out), jnp.float32, minval=-bound, maxval=bound)
    return params


def prepare_params(params):
    """One-time host-side prep: cast weights to bf16 (biases stay f32 for the VPU add).
    No lane/sublane padding -- Mosaic handles the small (D,128)/(128,D) edges."""
    return {
        "w1": params["w1"].astype(jnp.bfloat16), "b1": params["b1"].astype(jnp.float32),
        "w2": params["w2"].astype(jnp.bfloat16), "b2": params["b2"].astype(jnp.float32),
        "w3": params["w3"].astype(jnp.bfloat16), "b3": params["b3"].astype(jnp.float32),
        "w4": params["w4"].astype(jnp.bfloat16), "b4": params["b4"].astype(jnp.float32),
    }


@functools.partial(jax.jit, static_argnames=("tile_b", "num_tensorcores"))
def gradhnn_forward(u, prepped, tile_b=2048, num_tensorcores=1):
    """u: [B, manifold_dim] f32.  prepped: output of prepare_params().
    Pass num_tensorcores=2 on v7x so the grid spans both TensorCores."""
    B, D = u.shape
    H = prepped["w2"].shape[0]

    # Batch tile: as large as requested, shrunk only when B is genuinely small; keep the
    # sublane dim a multiple of 8.  On 2-TC parts ensure >= 2 grid steps when B allows it.
    tile = min(tile_b, _round_up(B, 8))
    if num_tensorcores >= 2 and B >= 16 and _cdiv(B, tile) < 2:
        tile = _round_up(_cdiv(B, 2), 8)
    grid = (_cdiv(B, tile),)

    def batch_tiled(i):
        return (i, 0)

    def whole(i):
        return (0, 0)

    in_specs = [
        pl.BlockSpec((tile, D), batch_tiled),    # u (f32, cast in-kernel)
        pl.BlockSpec((D, H), whole),             # w1
        pl.BlockSpec((1, H), whole),             # b1
        pl.BlockSpec((H, H), whole),             # w2
        pl.BlockSpec((1, H), whole),             # b2
        pl.BlockSpec((H, H), whole),             # w3
        pl.BlockSpec((1, H), whole),             # b3
        pl.BlockSpec((H, D), whole),             # w4
        pl.BlockSpec((1, D), whole),             # b4
    ]
    out_spec = pl.BlockSpec((tile, D), batch_tiled)

    flops = 2 * B * (D * H + H * H + H * H + H * D)
    bytes_accessed = (
        B * D * 4                                 # u (f32)
        + (D * H + H * H + H * H + H * D) * 2     # weights (bf16)
        + (3 * H + D) * 4                         # biases (f32)
        + B * D * 4                               # output (f32)
    )

    out = pl.pallas_call(
        _gradhnn_kernel,
        out_shape=jax.ShapeDtypeStruct((B, D), u.dtype),
        grid_spec=pltpu.PrefetchScalarGridSpec(
            num_scalar_prefetch=0,
            grid=grid,
            in_specs=in_specs,
            out_specs=out_spec,
        ),
        compiler_params=pltpu.CompilerParams(
            dimension_semantics=("parallel",),
            vmem_limit_bytes=32 * 1024 * 1024,
        ),
        cost_estimate=pl.CostEstimate(
            flops=flops, transcendentals=0, bytes_accessed=bytes_accessed),
    )(u,
      prepped["w1"], prepped["b1"],
      prepped["w2"], prepped["b2"],
      prepped["w3"], prepped["b3"],
      prepped["w4"], prepped["b4"])

    return out


def gradhnn_reference_bf16(u, params):
    """Reference with the same bf16-operand / f32-accumulate numerics as the kernel."""
    h = jnp.dot(u.astype(jnp.bfloat16), params["w1"].astype(jnp.bfloat16),
                preferred_element_type=jnp.float32)
    h = jnp.maximum(h + params["b1"], 0.0)
    h = jnp.dot(h.astype(jnp.bfloat16), params["w2"].astype(jnp.bfloat16),
                preferred_element_type=jnp.float32)
    h = jnp.maximum(h + params["b2"], 0.0)
    h = jnp.dot(h.astype(jnp.bfloat16), params["w3"].astype(jnp.bfloat16),
                preferred_element_type=jnp.float32)
    h = jnp.maximum(h + params["b3"], 0.0)
    return jnp.dot(h.astype(jnp.bfloat16), params["w4"].astype(jnp.bfloat16),
                   preferred_element_type=jnp.float32) + params["b4"]


def gradhnn_reference_f32(u, params):
    h = jnp.maximum(u @ params["w1"] + params["b1"], 0.0)
    h = jnp.maximum(h @ params["w2"] + params["b2"], 0.0)
    h = jnp.maximum(h @ params["w3"] + params["b3"], 0.0)
    return h @ params["w4"] + params["b4"]


if __name__ == "__main__":
    manifold_dim = 8
    batch = 40   # deliberately awkward size: not a multiple of 128, exercises small-B tiling

    key = jax.random.PRNGKey(0)
    key, ku = jax.random.split(key)
    u = jax.random.normal(ku, (batch, manifold_dim), jnp.float32)
    params = init_params(key, manifold_dim)
    prepped = prepare_params(params)

    out = gradhnn_forward(u, prepped)
    out = jax.block_until_ready(out)
    assert out.shape == (batch, manifold_dim)

    # Tight check vs a reference with identical bf16/f32 numerics.
    ref_bf16 = gradhnn_reference_bf16(u, params)
    assert jnp.allclose(out, ref_bf16, atol=2e-3, rtol=2e-3), \
        "Pallas output mismatch vs bf16-matched reference"

    # Loose sanity check vs the pure-f32 reference (bf16 rounding tolerance).
    ref_f32 = gradhnn_reference_f32(u, params)
    assert float(jnp.max(jnp.abs(out - ref_f32))) < 5e-2, \
        "Pallas output mismatch vs f32 reference beyond bf16 tolerance"

    print("KERNEL_OK")
</pallas_src>

<mosaic_0001>
module attributes {stable_mosaic.version = 11 : i64} {
  func.func @_gradhnn_kernel(%arg0: i32, %arg1: memref<40x8xf32, #tpu.memory_space<vmem>>, %arg2: memref<8x128xbf16, #tpu.memory_space<vmem>>, %arg3: memref<1x128xf32, #tpu.memory_space<vmem>>, %arg4: memref<128x128xbf16, #tpu.memory_space<vmem>>, %arg5: memref<1x128xf32, #tpu.memory_space<vmem>>, %arg6: memref<128x128xbf16, #tpu.memory_space<vmem>>, %arg7: memref<1x128xf32, #tpu.memory_space<vmem>>, %arg8: memref<128x8xbf16, #tpu.memory_space<vmem>>, %arg9: memref<1x8xf32, #tpu.memory_space<vmem>>, %arg10: memref<40x8xf32, #tpu.memory_space<vmem>>) attributes {dimension_semantics = [#tpu.dimension_semantics<parallel>], iteration_bounds = array<i64: 1>, scalar_prefetch = 0 : i64, scratch_operands = 0 : i64, tpu.core_type = #tpu.core_type<tc>, window_params = [{transform_indices = @transform_0, window_bounds = array<i64: 40, 8>}, {pipeline_mode = #tpu.pipeline_mode<synchronous>, transform_indices = @transform_1, window_bounds = array<i64: 8, 128>}, {pipeline_mode = #tpu.pipeline_mode<synchronous>, transform_indices = @transform_2, window_bounds = array<i64: 1, 128>}, {pipeline_mode = #tpu.pipeline_mode<synchronous>, transform_indices = @transform_3, window_bounds = array<i64: 128, 128>}, {pipeline_mode = #tpu.pipeline_mode<synchronous>, transform_indices = @transform_4, window_bounds = array<i64: 1, 128>}, {pipeline_mode = #tpu.pipeline_mode<synchronous>, transform_indices = @transform_5, window_bounds = array<i64: 128, 128>}, {pipeline_mode = #tpu.pipeline_mode<synchronous>, transform_indices = @transform_6, window_bounds = array<i64: 1, 128>}, {pipeline_mode = #tpu.pipeline_mode<synchronous>, transform_indices = @transform_7, window_bounds = array<i64: 128, 8>}, {pipeline_mode = #tpu.pipeline_mode<synchronous>, transform_indices = @transform_8, window_bounds = array<i64: 1, 8>}, {transform_indices = @transform_9, window_bounds = array<i64: 40, 8>}]} {
    %c0 = arith.constant 0 : index
    %c0_0 = arith.constant 0 : index
    %0 = vector.load %arg1[%c0, %c0_0] : memref<40x8xf32, #tpu.memory_space<vmem>>, vector<40x8xf32>
    %1 = arith.truncf %0 : vector<40x8xf32> to vector<40x8xbf16>
    %c0_1 = arith.constant 0 : index
    %c0_2 = arith.constant 0 : index
    %2 = vector.load %arg2[%c0_1, %c0_2] : memref<8x128xbf16, #tpu.memory_space<vmem>>, vector<8x128xbf16>
    %cst = arith.constant dense<0.000000e+00> : vector<40x128xf32>
    %3 = tpu.matmul %1, %2, %cst {dimension_numbers = #tpu.dot_dimension_numbers<[1], [0], [0], [1], [0, 0, 1, 1], [], []>} : vector<40x8xbf16>, vector<8x128xbf16>, vector<40x128xf32> -> vector<40x128xf32>
    %c0_3 = arith.constant 0 : index
    %c0_4 = arith.constant 0 : index
    %4 = vector.load %arg3[%c0_3, %c0_4] : memref<1x128xf32, #tpu.memory_space<vmem>>, vector<1x128xf32>
    %5 = vector.broadcast %4 : vector<1x128xf32> to vector<40x128xf32>
    %6 = arith.addf %3, %5 : vector<40x128xf32>
    %cst_5 = arith.constant 0.000000e+00 : f32
    %7 = vector.broadcast %cst_5 : f32 to vector<40x128xf32>
    %8 = arith.maximumf %6, %7 : vector<40x128xf32>
    %9 = arith.truncf %8 : vector<40x128xf32> to vector<40x128xbf16>
    %c0_6 = arith.constant 0 : index
    %c0_7 = arith.constant 0 : index
    %10 = vector.load %arg4[%c0_6, %c0_7] : memref<128x128xbf16, #tpu.memory_space<vmem>>, vector<128x128xbf16>
    %cst_8 = arith.constant dense<0.000000e+00> : vector<40x128xf32>
    %11 = tpu.matmul %9, %10, %cst_8 {dimension_numbers = #tpu.dot_dimension_numbers<[1], [0], [0], [1], [0, 0, 1, 1], [], []>} : vector<40x128xbf16>, vector<128x128xbf16>, vector<40x128xf32> -> vector<40x128xf32>
    %c0_9 = arith.constant 0 : index
    %c0_10 = arith.constant 0 : index
    %12 = vector.load %arg5[%c0_9, %c0_10] : memref<1x128xf32, #tpu.memory_space<vmem>>, vector<1x128xf32>
    %13 = vector.broadcast %12 : vector<1x128xf32> to vector<40x128xf32>
    %14 = arith.addf %11, %13 : vector<40x128xf32>
    %cst_11 = arith.constant 0.000000e+00 : f32
    %15 = vector.broadcast %cst_11 : f32 to vector<40x128xf32>
    %16 = arith.maximumf %14, %15 : vector<40x128xf32>
    %17 = arith.truncf %16 : vector<40x128xf32> to vector<40x128xbf16>
    %c0_12 = arith.constant 0 : index
    %c0_13 = arith.constant 0 : index
    %18 = vector.load %arg6[%c0_12, %c0_13] : memref<128x128xbf16, #tpu.memory_space<vmem>>, vector<128x128xbf16>
    %cst_14 = arith.constant dense<0.000000e+00> : vector<40x128xf32>
    %19 = tpu.matmul %17, %18, %cst_14 {dimension_numbers = #tpu.dot_dimension_numbers<[1], [0], [0], [1], [0, 0, 1, 1], [], []>} : vector<40x128xbf16>, vector<128x128xbf16>, vector<40x128xf32> -> vector<40x128xf32>
    %c0_15 = arith.constant 0 : index
    %c0_16 = arith.constant 0 : index
    %20 = vector.load %arg7[%c0_15, %c0_16] : memref<1x128xf32, #tpu.memory_space<vmem>>, vector<1x128xf32>
    %21 = vector.broadcast %20 : vector<1x128xf32> to vector<40x128xf32>
    %22 = arith.addf %19, %21 : vector<40x128xf32>
    %cst_17 = arith.constant 0.000000e+00 : f32
    %23 = vector.broadcast %cst_17 : f32 to vector<40x128xf32>
    %24 = arith.maximumf %22, %23 : vector<40x128xf32>
    %25 = arith.truncf %24 : vector<40x128xf32> to vector<40x128xbf16>
    %c0_18 = arith.constant 0 : index
    %c0_19 = arith.constant 0 : index
    %26 = vector.load %arg8[%c0_18, %c0_19] : memref<128x8xbf16, #tpu.memory_space<vmem>>, vector<128x8xbf16>
    %cst_20 = arith.constant dense<0.000000e+00> : vector<40x8xf32>
    %27 = tpu.matmul %25, %26, %cst_20 {dimension_numbers = #tpu.dot_dimension_numbers<[1], [0], [0], [1], [0, 0, 1, 1], [], []>} : vector<40x128xbf16>, vector<128x8xbf16>, vector<40x8xf32> -> vector<40x8xf32>
    %c0_21 = arith.constant 0 : index
    %c0_22 = arith.constant 0 : index
    %28 = vector.load %arg9[%c0_21, %c0_22] : memref<1x8xf32, #tpu.memory_space<vmem>>, vector<1x8xf32>
    %29 = vector.broadcast %28 : vector<1x8xf32> to vector<40x8xf32>
    %30 = arith.addf %27, %29 : vector<40x8xf32>
    %c0_23 = arith.constant 0 : index
    %c0_24 = arith.constant 0 : index
    %31 = vector.load %arg10[%c0_23, %c0_24] : memref<40x8xf32, #tpu.memory_space<vmem>>, vector<40x8xf32>
    tpu.vector_store %arg10[%c0_23, %c0_24], %30 {strides = array<i32>} : memref<40x8xf32, #tpu.memory_space<vmem>>, vector<40x8xf32>,
    return
  }
  func.func @transform_0(%arg0: i32) -> (i32, i32) {
    %c0_i32 = arith.constant 0 : i32
    %c0_i32_0 = arith.constant 0 : i32
    return %arg0, %c0_i32 : i32, i32
  }
  func.func @transform_1(%arg0: i32) -> (i32, i32) {
    %c0_i32 = arith.constant 0 : i32
    %c0_i32_0 = arith.constant 0 : i32
    %c0_i32_1 = arith.constant 0 : i32
    return %c0_i32, %c0_i32_0 : i32, i32
  }
  func.func @transform_2(%arg0: i32) -> (i32, i32) {
    %c0_i32 = arith.constant 0 : i32
    %c0_i32_0 = arith.constant 0 : i32
    %c0_i32_1 = arith.constant 0 : i32
    return %c0_i32, %c0_i32_0 : i32, i32
  }
  func.func @transform_3(%arg0: i32) -> (i32, i32) {
    %c0_i32 = arith.constant 0 : i32
    %c0_i32_0 = arith.constant 0 : i32
    %c0_i32_1 = arith.constant 0 : i32
    return %c0_i32, %c0_i32_0 : i32, i32
  }
  func.func @transform_4(%arg0: i32) -> (i32, i32) {
    %c0_i32 = arith.constant 0 : i32
    %c0_i32_0 = arith.constant 0 : i32
    %c0_i32_1 = arith.constant 0 : i32
    return %c0_i32, %c0_i32_0 : i32, i32
  }
  func.func @transform_5(%arg0: i32) -> (i32, i32) {
    %c0_i32 = arith.constant 0 : i32
    %c0_i32_0 = arith.constant 0 : i32
    %c0_i32_1 = arith.constant 0 : i32
    return %c0_i32, %c0_i32_0 : i32, i32
  }
  func.func @transform_6(%arg0: i32) -> (i32, i32) {
    %c0_i32 = arith.constant 0 : i32
    %c0_i32_0 = arith.constant 0 : i32
    %c0_i32_1 = arith.constant 0 : i32
    return %c0_i32, %c0_i32_0 : i32, i32
  }
  func.func @transform_7(%arg0: i32) -> (i32, i32) {
    %c0_i32 = arith.constant 0 : i32
    %c0_i32_0 = arith.constant 0 : i32
    %c0_i32_1 = arith.constant 0 : i32
    return %c0_i32, %c0_i32_0 : i32, i32
  }
  func.func @transform_8(%arg0: i32) -> (i32, i32) {
    %c0_i32 = arith.constant 0 : i32
    %c0_i32_0 = arith.constant 0 : i32
    %c0_i32_1 = arith.constant 0 : i32
    return %c0_i32, %c0_i32_0 : i32, i32
  }
  func.func @transform_9(%arg0: i32) -> (i32, i32) {
    %c0_i32 = arith.constant 0 : i32
    %c0_i32_0 = arith.constant 0 : i32
    return %arg0, %c0_i32 : i32, i32
  }
}

</mosaic_0001>

<bundles_post_ra>
// kernel: gradhnn_forward.1
= control target key start
LH: loop header
LB: loop body
LE: loop exit
PB: predicated region body
PF: predicated region fallthrough
CT: control target
= control target key end

     0   :  { %14 = vsyncpa [#allocation3], 0  ;;  %s1152_s0 = inlined_call_operand.vmem [shape: f32[40,8], index: 0, kind: input, shape index: {}]   ;;  %s1153_s1 = inlined_call_operand.hbm [shape: bf16[8,128], index: 1, kind: input, shape index: {}]   ;;  %s1154_s2 = inlined_call_operand.hbm [shape: f32[1,128], index: 2, kind: input, shape index: {}]   ;;  %s1155_s3 = inlined_call_operand.vmem [shape: bf16[128,128], index: 3, kind: input, shape index: {}]   ;;  %s1156_s4 = inlined_call_operand.hbm [shape: f32[1,128], index: 4, kind: input, shape index: {}]   ;;  %s1157_s5 = inlined_call_operand.vmem [shape: bf16[128,128], index: 5, kind: input, shape index: {}]   ;;  %s1158_s6 = inlined_call_operand.hbm [shape: f32[1,128], index: 6, kind: input, shape index: {}]   ;;  %s1159_s7 = inlined_call_operand.vmem [shape: bf16[128,8], index: 7, kind: input, shape index: {}]   ;;  %s1160_s8 = inlined_call_operand.hbm [shape: f32[1,8], index: 8, kind: input, shape index: {}]   ;;  %s1161_s9 = inlined_call_operand.vmem [shape: f32[40,8], index: 9, kind: output, shape index: {}]  }
   0x1   :  { %15 = vsyncpa [#allocation5], 0 }
   0x2   :  { %16 = vsyncpa [#allocation8], 0  ;;  %s913_s30 = smov [#allocation4]   ;;  %s914_s11 = smov [#allocation7]  }
   0x3   :  { %s35_s10 = sshll.u32 %s913_s30, 4  ;;  %s59_s12 = sshll.u32 %s914_s11, 4  ;;  %s36_s10 = int_to_ptr.vmem [resolvable:$true] %s35_s10  ;;  %s60_s12 = int_to_ptr.vmem [resolvable:$true] %s59_s12 }
   0x4   :  { %s815_s13 = scalar_lea.vmem %s36_s10, 16  ;;  %s819_s14 = scalar_lea.vmem %s36_s10, 32 }
   0x5   :  { %p816_p0 = scmp.ne.s32.totalorder %s36_s10, %s815_s13  ;;  %p820_p1 = scmp.lt.s32.totalorder %s36_s10, %s36_s10 }
   0x6   :  { %p821_p2 = scmp.lt.s32.totalorder %s819_s14, %s815_s13 }
   0x8   :  { %p822_p3 = por %p821_p2, %p820_p1 }
   0xa   :  { %p823_p4 = pnand %p822_p3, %p816_p0 }
   0xc   :  { %826 = shalt.err (!%p823_p4)
}
   0xd   :  { %38 = dma.hbm_to_vmem [thread:$0]  %s1154_s2, 16, %s36_s10, [#allocation5]  }
   0xe   :  { %s835_s17 = scalar_lea.vmem %s60_s12, 16  ;;  %s839_s18 = scalar_lea.vmem %s60_s12, 32 }
   0xf   :  { %p836_p5 = scmp.ne.s32.totalorder %s60_s12, %s835_s17  ;;  %p840_p6 = scmp.lt.s32.totalorder %s60_s12, %s60_s12 }
  0x10   :  { %p841_p7 = scmp.lt.s32.totalorder %s839_s18, %s835_s17 }
  0x12   :  { %p842_p8 = por %p841_p7, %p840_p6 }
  0x14   :  { %p843_p9 = pnand %p842_p8, %p836_p5 }
  0x16   :  { %846 = shalt.err (!%p843_p9)
}
  0x17   :  { %62 = dma.hbm_to_vmem [thread:$0]  %s1158_s6, 16, %s60_s12, [#allocation8]  }
  0x18   :  { %s915_s21 = smov [#allocation2]   ;;  %s916_s23 = smov [#allocation6]  }
  0x19   :  { %s25_s22 = sshll.u32 %s915_s21, 4  ;;  %s47_s24 = sshll.u32 %s916_s23, 4  ;;  %s26_s22 = int_to_ptr.vmem [resolvable:$true] %s25_s22  ;;  %s48_s24 = int_to_ptr.vmem [resolvable:$true] %s47_s24 }
  0x1a   :  { %s855_s25 = scalar_lea.vmem %s26_s22, 64  ;;  %p860_p11 = scmp.lt.s32.totalorder %s26_s22, %s26_s22 }
  0x1b   :  { %p856_p10 = scmp.ne.s32.totalorder %s26_s22, %s855_s25  ;;  %p861_p12 = scmp.lt.s32.totalorder %s855_s25, %s855_s25 }
  0x1d   :  { %p862_p13 = por %p861_p12, %p860_p11 }
  0x1f   :  { %p863_p0 = pnand %p862_p13, %p856_p10 }
  0x21   :  { %866 = shalt.err (!%p863_p0)
}
  0x22   :  { %28 = dma.hbm_to_vmem [thread:$0]  %s1153_s1, 64, %s26_s22, [#allocation3]  }
  0x23   :  { %s875_s27 = scalar_lea.vmem %s48_s24, 16  ;;  %s879_s6 = scalar_lea.vmem %s48_s24, 32 }
  0x24   :  { %p876_p1 = scmp.ne.s32.totalorder %s48_s24, %s875_s27  ;;  %p880_p2 = scmp.lt.s32.totalorder %s48_s24, %s48_s24 }
  0x25   :  { %p881_p3 = scmp.lt.s32.totalorder %s879_s6, %s875_s27 }
  0x27   :  { %p882_p4 = por %p881_p3, %p880_p2 }
  0x29   :  { %p883_p5 = pnand %p882_p4, %p876_p1 }
  0x2b   :  { %886 = shalt.err (!%p883_p5)
}
  0x2c   :  { %50 = dma.hbm_to_vmem [thread:$0]  %s1156_s4, 16, %s48_s24, [#allocation5]  }
  0x2d   :  { %s917_s30 = smov [#allocation9]  }
  0x2e   :  { %s71_s10 = sshll.u32 %s917_s30, 4  ;;  %s72_s10 = int_to_ptr.vmem [resolvable:$true] %s71_s10 }
  0x2f   :  { %s895_s11 = scalar_lea.vmem %s72_s10, 16  ;;  %s899_s12 = scalar_lea.vmem %s72_s10, 32 }
  0x30   :  { %p896_p6 = scmp.ne.s32.totalorder %s72_s10, %s895_s11  ;;  %p900_p7 = scmp.lt.s32.totalorder %s72_s10, %s72_s10 }
  0x31   :  { %p901_p8 = scmp.lt.s32.totalorder %s899_s12, %s895_s11 }
  0x33   :  { %p902_p9 = por %p901_p8, %p900_p7 }
  0x35   :  { %p903_p10 = pnand %p902_p9, %p896_p6 }
  0x37   :  { %906 = shalt.err (!%p903_p10)
}
  0x38   :  { %74 = dma.hbm_to_vmem [thread:$0]  %s1160_s8, 16, %s72_s10, [#allocation8]  }
  0x39   :  { %907 = dma.done.wait [#allocation3], 64  }
  0x3a   :  { %908 = vsyncadd [#allocation3], 4294967232 }
  0x3b   :  { %909 = dma.done.wait [#allocation5], 32  }
  0x3c   :  { %910 = vsyncadd [#allocation5], 4294967264 }
  0x3d   :  { %911 = dma.done.wait [#allocation8], 32  }
  0x3e   :  { %912 = vsyncadd [#allocation8], 4294967264  ;;  %v918_v0 = vmov 0.0   ;;  %vm919_vm0 = vmmov 0   ;;  %vm117_vm1 = vcmask 1043456   ;;  %v91_v2 = vld [vmem:[%s1152_s0] sm:$0xff] }
  0x3f   :  { %662 = vmatprep.subr.bf16.mxu0 %v918_v0  ;;  %664 = vmatprep.mubr.msk.bf16.mxu0 %vm919_vm0, %v918_v0  ;;  %v99_v1 = vld [vmem:[#allocation2] sm:$0xf]  ;;  %v92_v3 = vld [vmem:[%s1152_s0 + $0x8] sm:$0xff]  ;;  %vm107_vm2 = vcmask 64512   ;;  %v783_v6 = vld [vmem:[%s1155_s3 + $0x38] sm:$0xff]  }
  0x40   :  { %676 = vmatprep.subr.bf16.mxu1 %v918_v0  ;;  %692 = vmatprep.mubr.msk.bf16.mxu1 %vm919_vm0, %v918_v0  ;;  %v119_v4 = vsel %vm117_vm1, %v99_v1, 0  ;;  %v96_v5 = vpack.c.bf16 %v92_v3, %v91_v2  ;;  %v784_v7 = vld [vmem:[%s1155_s3 + $0x30] sm:$0xff]   ;;  %v94_v9 = vld [vmem:[%s1152_s0 + $0x18] sm:$0xff]  ;;  %v785_v10 = vld [vmem:[%s1155_s3 + $0x28] sm:$0xff]  }
  0x41   :  { %663 = vmatpush3.bf16.msra.mxu0 %v119_v4  ;;  %677 = vmatpush3.bf16.msra.mxu1 %v783_v6  ;;  %v93_v8 = vld [vmem:[%s1152_s0 + $0x10] sm:$0xff]  ;;  %v786_v12 = vld [vmem:[%s1155_s3 + $0x20] sm:$0xff]   ;;  %v787_v14 = vld [vmem:[%s1155_s3 + $0x18] sm:$0xff]  }
  0x42   :  { %704 = vmatprep.subr.bf16.mxu0 %v918_v0  ;;  %678 = vmatprep.subr.bf16.mxu1 %v918_v0  ;;  %v97_v11 = vpack.c.bf16 %v94_v9, %v93_v8  ;;  %v95_v13 = vld [vmem:[%s1152_s0 + $0x20] sm:$0xff]  ;;  %v788_v16 = vld [vmem:[%s1155_s3 + $0x10] sm:$0xff]   ;;  %v789_v17 = vld [vmem:[%s1155_s3 + $0x8] sm:$0xff]  }
  0x43   :  { %v98_v15 = vpack.c.bf16 %v95_v13, %v95_v13  ;;  %v790_v18 = vld [vmem:[%s1155_s3] sm:$0xff]   ;;  %v791_v19 = vld [vmem:[%s1157_s5 + $0x38] sm:$0xff]   ;;  %v792_v20 = vld [vmem:[%s1157_s5 + $0x30] sm:$0xff]  }
  0x44   :  { %665 = vmatmul.mubr.msk.bf16.vlgmr.msra.gmra.mxu0 %vm107_vm2, %v96_v5  ;;  %v793_v21 = vld [vmem:[%s1157_s5 + $0x28] sm:$0xff]   ;;  %v794_v22 = vld [vmem:[%s1157_s5 + $0x20] sm:$0xff]   ;;  %v795_v23 = vld [vmem:[%s1157_s5 + $0x18] sm:$0xff]  }
  0x45   :  { %668 = vmatprep.mubr.msk.bf16.mxu0 %vm919_vm0, %v918_v0  ;;  %679 = vmatpush3.bf16.msra.mxu1 %v784_v7  ;;  %v594_v24 = vld [vmem:[#allocation4] ss:$0 sm:$0xff]  ;;  %v796_v50 = vld [vmem:[%s1157_s5 + $0x10] sm:$0xff]   ;;  %v797_v51 = vld [vmem:[%s1157_s5 + $0x8] sm:$0xff]  }
  0x46   :  { %680 = vmatprep.subr.bf16.mxu1 %v918_v0  ;;  %705 = vmatpush3.bf16.msra.mxu0 %v791_v19  ;;  %v798_v52 = vld [vmem:[%s1157_s5] sm:$0xff]   ;;  %v799_v53 = vld [vmem:[%s1159_s7 + $0x38] sm:$0xff]   ;;  %v800_v54 = vld [vmem:[%s1159_s7 + $0x30] sm:$0xff]  }
  0x47   :  { %706 = vmatprep.subr.bf16.mxu0 %v918_v0  ;;  %v801_v55 = vld [vmem:[%s1159_s7 + $0x28] sm:$0xff]   ;;  %v802_v56 = vld [vmem:[%s1159_s7 + $0x20] sm:$0xff]   ;;  %v803_v57 = vld [vmem:[%s1159_s7 + $0x18] sm:$0xff]  }
  0x48   :  { %v598_v58 = vld [vmem:[#allocation6] ss:$0 sm:$0xff] }
  0x49   :  { %681 = vmatpush3.bf16.msra.mxu1 %v785_v10 }
  0x4a   :  { %682 = vmatprep.subr.bf16.mxu1 %v918_v0  ;;  %707 = vmatpush3.bf16.msra.mxu0 %v792_v20 }
  0x4b   :  { %708 = vmatprep.subr.bf16.mxu0 %v918_v0 }
  0x4c   :  { %669 = vmatmul.mubr.msk.bf16.gmra.mxu0 %vm107_vm2, %v97_v11 }
  0x4d   :  { %672 = vmatprep.mubr.msk.bf16.mxu0 %vm919_vm0, %v918_v0  ;;  %683 = vmatpush3.bf16.msra.mxu1 %v786_v12 }
  0x4e   :  { %684 = vmatprep.subr.bf16.mxu1 %v918_v0  ;;  %709 = vmatpush3.bf16.msra.mxu0 %v793_v21  ;;  %v804_v21 = vld [vmem:[%s1159_s7 + $0x10] sm:$0xff]  }
  0x4f   :  { %710 = vmatprep.subr.bf16.mxu0 %v918_v0 }
  0x51   :  { %685 = vmatpush3.bf16.msra.mxu1 %v787_v14 }
  0x52   :  { %686 = vmatprep.subr.bf16.mxu1 %v918_v0  ;;  %711 = vmatpush3.bf16.msra.mxu0 %v794_v22  ;;  %v805_v22 = vld [vmem:[%s1159_s7 + $0x8] sm:$0xff]  }
  0x53   :  { %712 = vmatprep.subr.bf16.mxu0 %v918_v0 }
  0x54   :  { %673 = vmatmul.mubr.msk.bf16.gmra.mxu0 %vm107_vm2, %v98_v15 }
  0x55   :  { %720 = vmatprep.mubr.msk.bf16.mxu0 %vm919_vm0, %v918_v0  ;;  %687 = vmatpush3.bf16.msra.mxu1 %v788_v16 }
  0x56   :  { %688 = vmatprep.subr.bf16.mxu1 %v918_v0  ;;  %713 = vmatpush3.bf16.msra.mxu0 %v795_v23  ;;  %v806_v23 = vld [vmem:[%s1159_s7] sm:$0xff]  }
  0x57   :  { %714 = vmatprep.subr.bf16.mxu0 %v918_v0 }
  0x59   :  { %689 = vmatpush3.bf16.msra.mxu1 %v789_v17 }
  0x5a   :  { %690 = vmatprep.subr.bf16.mxu1 %v918_v0  ;;  %715 = vmatpush3.bf16.msra.mxu0 %v796_v50  ;;  %v616_v50 = vld [vmem:[#allocation9] ss:$0 sm:$0xff] }
  0x5b   :  { %716 = vmatprep.subr.bf16.mxu0 %v918_v0 }
  0x5d   :  { %691 = vmatpush3.bf16.msra.mxu1 %v790_v18 }
  0x5e   :  { %760 = vmatprep.subr.bf16.mxu1 %v918_v0  ;;  %717 = vmatpush3.bf16.msra.mxu0 %v797_v51 }
  0x5f   :  { %718 = vmatprep.subr.bf16.mxu0 %v918_v0 }
  0x62   :  { %719 = vmatpush3.bf16.msra.mxu0 %v798_v52 }
  0x63   :  { %732 = vmatprep.subr.bf16.mxu0 %v918_v0 }
 0x104   :  { %v155_v25 = vpop.f32.mrf.mxu0 }
 0x105   :  { %v156_v27 = vadd.f32 %v594_v24, %v155_v25 }
 0x106   :  { %v666_v26 = vpop.f32.mrf.mxu0 }
 0x107   :  { %v177_v31 = vmax.f32 %v156_v27, 0.0 }
 0x108   :  { %v158_v28 = vpop.f32.mrf.mxu0 }
 0x109   :  { %v159_v29 = vadd.f32 %v594_v24, %v158_v28 }
 0x10a   :  { %v667_v30 = vpop.f32.mrf.mxu0 }
 0x10b   :  { %v178_v32 = vmax.f32 %v159_v29, 0.0 }
 0x10c   :  { %v163_v33 = vpop.f32.mrf.mxu0 }
 0x10d   :  { %v182_v34 = vpack.c.bf16 %v178_v32, %v177_v31  ;;  %v164_v36 = vadd.f32 %v594_v24, %v163_v33 }
 0x10e   :  { %v670_v35 = vpop.f32.mrf.mxu0 }
 0x10f   :  { %693 = vmatmul.mubr.bf16.vlgmr.msra.gmra.mxu1 %v182_v34  ;;  %v179_v40 = vmax.f32 %v164_v36, 0.0 }
 0x110   :  { %v166_v37 = vpop.f32.mrf.mxu0  ;;  %696 = vmatprep.mubr.msk.bf16.mxu1 %vm919_vm0, %v918_v0  ;;  %768 = vmatpush3.bf16.msra.mxu1 %v799_v53 }
 0x111   :  { %v167_v38 = vadd.f32 %v594_v24, %v166_v37  ;;  %761 = vmatprep.subr.bf16.mxu1 %v918_v0 }
 0x112   :  { %v671_v39 = vpop.f32.mrf.mxu0 }
 0x113   :  { %v180_v41 = vmax.f32 %v167_v38, 0.0 }
 0x114   :  { %v171_v42 = vpop.f32.mrf.mxu0  ;;  %769 = vmatpush3.bf16.msra.mxu1 %v800_v54 }
 0x115   :  { %v183_v43 = vpack.c.bf16 %v180_v41, %v179_v40  ;;  %v172_v44 = vadd.f32 %v594_v24, %v171_v42  ;;  %762 = vmatprep.subr.bf16.mxu1 %v918_v0  ;;  %v607_v24 = vld [vmem:[#allocation7] ss:$0 sm:$0xff] }
 0x116   :  { %v674_v45 = vpop.f32.mrf.mxu0 }
 0x117   :  { %697 = vmatmul.mubr.bf16.gmra.mxu1 %v183_v43  ;;  %v181_v46 = vmax.f32 %v172_v44, 0.0 }
 0x118   :  { %v174_v47 = vpop.f32.mrf.mxu0  ;;  %700 = vmatprep.mubr.msk.bf16.mxu1 %vm919_vm0, %v918_v0  ;;  %770 = vmatpush3.bf16.msra.mxu1 %v801_v55 }
 0x119   :  { %v184_v49 = vpack.c.bf16 %v181_v46, %v181_v46  ;;  %763 = vmatprep.subr.bf16.mxu1 %v918_v0 }
 0x11a   :  { %v675_v48 = vpop.f32.mrf.mxu0 }
 0x11c   :  { %771 = vmatpush3.bf16.msra.mxu1 %v802_v56 }
 0x11d   :  { %764 = vmatprep.subr.bf16.mxu1 %v918_v0 }
 0x11f   :  { %701 = vmatmul.mubr.bf16.gmra.mxu1 %v184_v49 }
 0x120   :  { %752 = vmatprep.mubr.msk.bf16.mxu1 %vm919_vm0, %v918_v0  ;;  %772 = vmatpush3.bf16.msra.mxu1 %v803_v57 }
 0x121   :  { %765 = vmatprep.subr.bf16.mxu1 %v918_v0 }
 0x124   :  { %773 = vmatpush3.bf16.msra.mxu1 %v804_v21 }
 0x125   :  { %766 = vmatprep.subr.bf16.mxu1 %v918_v0 }
 0x128   :  { %774 = vmatpush3.bf16.msra.mxu1 %v805_v22 }
 0x129   :  { %767 = vmatprep.subr.bf16.mxu1 %v918_v0 }
 0x12c   :  { %775 = vmatpush3.bf16.msra.mxu1 %v806_v23 }
 0x1cf   :  { %v290_v59 = vpop.f32.mrf.mxu1 }
 0x1d0   :  { %v291_v61 = vadd.f32 %v598_v58, %v290_v59 }
 0x1d1   :  { %v694_v60 = vpop.f32.mrf.mxu1 }
 0x1d2   :  { %v312_v2 = vmax.f32 %v291_v61, 0.0 }
 0x1d3   :  { %v293_v62 = vpop.f32.mrf.mxu1 }
 0x1d4   :  { %v294_v63 = vadd.f32 %v598_v58, %v293_v62 }
 0x1d5   :  { %v695_v1 = vpop.f32.mrf.mxu1 }
 0x1d6   :  { %v313_v3 = vmax.f32 %v294_v63, 0.0 }
 0x1d7   :  { %v298_v4 = vpop.f32.mrf.mxu1 }
 0x1d8   :  { %v317_v5 = vpack.c.bf16 %v313_v3, %v312_v2  ;;  %v299_v7 = vadd.f32 %v598_v58, %v298_v4 }
 0x1d9   :  { %v698_v6 = vpop.f32.mrf.mxu1 }
 0x1da   :  { %721 = vmatmul.mubr.bf16.vlgmr.msra.gmra.mxu0 %v317_v5  ;;  %v314_v11 = vmax.f32 %v299_v7, 0.0 }
 0x1db   :  { %v301_v8 = vpop.f32.mrf.mxu1  ;;  %724 = vmatprep.mubr.msk.bf16.mxu0 %vm919_vm0, %v918_v0  ;;  %733 = vmatpush3.bf16.msra.mxu0 %v799_v53 }
 0x1dc   :  { %v302_v9 = vadd.f32 %v598_v58, %v301_v8  ;;  %734 = vmatprep.subr.bf16.mxu0 %v918_v0 }
 0x1dd   :  { %v699_v10 = vpop.f32.mrf.mxu1 }
 0x1de   :  { %v315_v12 = vmax.f32 %v302_v9, 0.0 }
 0x1df   :  { %v306_v13 = vpop.f32.mrf.mxu1  ;;  %735 = vmatpush3.bf16.msra.mxu0 %v800_v54 }
 0x1e0   :  { %v318_v14 = vpack.c.bf16 %v315_v12, %v314_v11  ;;  %v307_v15 = vadd.f32 %v598_v58, %v306_v13  ;;  %736 = vmatprep.subr.bf16.mxu0 %v918_v0 }
 0x1e1   :  { %v702_v16 = vpop.f32.mrf.mxu1 }
 0x1e2   :  { %v316_v17 = vmax.f32 %v307_v15, 0.0  ;;  %725 = vmatmul.mubr.bf16.gmra.mxu0 %v318_v14 }
 0x1e3   :  { %v309_v18 = vpop.f32.mrf.mxu1  ;;  %728 = vmatprep.mubr.msk.bf16.mxu0 %vm919_vm0, %v918_v0  ;;  %737 = vmatpush3.bf16.msra.mxu0 %v801_v55 }
 0x1e4   :  { %738 = vmatprep.subr.bf16.mxu0 %v918_v0  ;;  %v319_v20 = vpack.c.bf16 %v316_v17, %v316_v17 }
 0x1e5   :  { %v703_v19 = vpop.f32.mrf.mxu1 }
 0x1e7   :  { %739 = vmatpush3.bf16.msra.mxu0 %v802_v56 }
 0x1e8   :  { %740 = vmatprep.subr.bf16.mxu0 %v918_v0 }
 0x1ea   :  { %729 = vmatmul.mubr.bf16.gmra.mxu0 %v319_v20 }
 0x1eb   :  { %741 = vmatpush3.bf16.msra.mxu0 %v803_v57  ;;  %748 = vmatprep.mubr.msk.bf16.mxu0 %vm919_vm0, %v918_v0 }
 0x1ec   :  { %742 = vmatprep.subr.bf16.mxu0 %v918_v0 }
 0x1ef   :  { %743 = vmatpush3.bf16.msra.mxu0 %v804_v21 }
 0x1f0   :  { %744 = vmatprep.subr.bf16.mxu0 %v918_v0 }
 0x1f3   :  { %745 = vmatpush3.bf16.msra.mxu0 %v805_v22 }
 0x1f4   :  { %746 = vmatprep.subr.bf16.mxu0 %v918_v0 }
 0x1f7   :  { %747 = vmatpush3.bf16.msra.mxu0 %v806_v23 }
 0x29a   :  { %v425_v25 = vpop.f32.mrf.mxu0 }
 0x29b   :  { %v426_v27 = vadd.f32 %v607_v24, %v425_v25 }
 0x29c   :  { %v722_v26 = vpop.f32.mrf.mxu0 }
 0x29d   :  { %v447_v31 = vmax.f32 %v426_v27, 0.0 }
 0x29e   :  { %v428_v28 = vpop.f32.mrf.mxu0 }
 0x29f   :  { %v429_v29 = vadd.f32 %v607_v24, %v428_v28 }
 0x2a0   :  { %v723_v30 = vpop.f32.mrf.mxu0 }
 0x2a1   :  { %v448_v32 = vmax.f32 %v429_v29, 0.0 }
 0x2a2   :  { %v433_v33 = vpop.f32.mrf.mxu0 }
 0x2a3   :  { %v452_v34 = vpack.c.bf16 %v448_v32, %v447_v31  ;;  %v434_v36 = vadd.f32 %v607_v24, %v433_v33 }
 0x2a4   :  { %v726_v35 = vpop.f32.mrf.mxu0 }
 0x2a5   :  { %749 = vmatmul.mubr.bf16.vlgmr.msra.gmra.mxu0 %v452_v34  ;;  %v449_v40 = vmax.f32 %v434_v36, 0.0 }
 0x2a6   :  { %v436_v37 = vpop.f32.mrf.mxu0 }
 0x2a7   :  { %v437_v38 = vadd.f32 %v607_v24, %v436_v37 }
 0x2a8   :  { %v727_v39 = vpop.f32.mrf.mxu0 }
 0x2a9   :  { %v450_v41 = vmax.f32 %v437_v38, 0.0 }
 0x2aa   :  { %v441_v42 = vpop.f32.mrf.mxu0 }
 0x2ab   :  { %v453_v43 = vpack.c.bf16 %v450_v41, %v449_v40  ;;  %v442_v44 = vadd.f32 %v607_v24, %v441_v42 }
 0x2ac   :  { %v730_v45 = vpop.f32.mrf.mxu0 }
 0x2ad   :  { %v451_v46 = vmax.f32 %v442_v44, 0.0  ;;  %753 = vmatmul.mubr.bf16.vlgmr.msra.gmra.mxu1 %v453_v43 }
 0x2ae   :  { %v444_v47 = vpop.f32.mrf.mxu0  ;;  %756 = vmatprep.mubr.msk.bf16.mxu1 %vm919_vm0, %v918_v0 }
 0x2af   :  { %v454_v49 = vpack.c.bf16 %v451_v46, %v451_v46 }
 0x2b0   :  { %v731_v48 = vpop.f32.mrf.mxu0 }
 0x2b5   :  { %757 = vmatmul.mubr.bf16.gmra.mxu1 %v454_v49 }
 0x365   :  { %v560_v51 = vpop.f32.mrf.mxu0 }
 0x366   :  { %v561_v52 = vadd.f32 %v616_v50, %v560_v51 }
 0x367   :  { %v750_v53 = vpop.f32.mrf.mxu0 }
 0x368   :  { %582 = vst.msk [vmem:[%s1161_s9] sm:$0xff] %vm107_vm2, %v561_v52 }
 0x369   :  { %v563_v54 = vpop.f32.mrf.mxu0 }
 0x36a   :  { %v564_v55 = vadd.f32 %v616_v50, %v563_v54 }
 0x36b   :  { %v751_v56 = vpop.f32.mrf.mxu0 }
 0x36c   :  { %583 = vst.msk [vmem:[%s1161_s9 + $0x8] sm:$0xff] %vm107_vm2, %v564_v55 }
 0x36d   :  { %v568_v0 = vpop.f32.mrf.mxu1 }
 0x36e   :  { %v569_v57 = vadd.f32 %v616_v50, %v568_v0 }
 0x36f   :  { %v754_v58 = vpop.f32.mrf.mxu1 }
 0x370   :  { %584 = vst.msk [vmem:[%s1161_s9 + $0x10] sm:$0xff] %vm107_vm2, %v569_v57 }
 0x371   :  { %v571_v59 = vpop.f32.mrf.mxu1 }
 0x372   :  { %v572_v60 = vadd.f32 %v616_v50, %v571_v59 }
 0x373   :  { %v755_v61 = vpop.f32.mrf.mxu1 }
 0x374   :  { %585 = vst.msk [vmem:[%s1161_s9 + $0x18] sm:$0xff] %vm107_vm2, %v572_v60 }
 0x375   :  { %v576_v62 = vpop.f32.mrf.mxu1 }
 0x376   :  { %v577_v63 = vadd.f32 %v616_v50, %v576_v62 }
 0x377   :  { %v758_v1 = vpop.f32.mrf.mxu1 }
 0x378   :  { %586 = vst.msk [vmem:[%s1161_s9 + $0x20] sm:$0xff] %vm107_vm2, %v577_v63 }
 0x379   :  { %v579_v2 = vpop.f32.mrf.mxu1 }
 0x37b   :  { %v759_v3 = vpop.f32.mrf.mxu1 }
 0x37c   :  { %591 = vsyncpa [#allocation3], 1 }
 0x37d   :  { %592 = vsyncpa [#allocation5], 1 }
 0x37e   :  { %593 = vsyncpa [#allocation8], 1 }

</bundles_post_ra>
